<compile_context>
chip_gen: v6e
topology: v6e:2x2x1
jax: 0.10.0
libtpu: 0.0.40
codegen_flags: <defaults>
</compile_context>

<pallas_src>
import functools

import jax
import jax.numpy as jnp
from jax.experimental import pallas as pl
from jax.experimental.pallas import tpu as pltpu


def _round_up(x, m):
    return ((x + m - 1) // m) * m


def lowrank_kernel(x_ref, w_ref, vt_ref, b_ref, o_ref, *, tile_n, n_out_tiles,
                   compute_dtype):
    # x_ref:  (TB, input_size)   batch tile, original dtype (cast here, not in wrapper)
    # w_ref:  (input_size, r_pad) folded U[:, :r] @ S[:r, :r], grid-invariant
    # vt_ref: (r_pad, out_pad)    full V[:, :r].T, VMEM-resident (DMA'd once)
    # b_ref:  (1, TN)             bias tile (f32)
    # o_ref:  (TB, TN)            output tile (lane-dense on output_size)
    x = x_ref[...].astype(compute_dtype)                     # in-kernel cast (VPU)
    xw = jnp.dot(x, w_ref[...], preferred_element_type=jnp.float32)

    if n_out_tiles == 1:
        vt = vt_ref[...]                                     # static full read
    else:
        # tile_n is a multiple of 128 in this branch -> lane-aligned slice.
        n0 = pl.multiple_of(pl.program_id(1) * tile_n, tile_n)
        vt = vt_ref[:, pl.ds(n0, tile_n)]

    out = jnp.dot(xw.astype(compute_dtype), vt,
                  preferred_element_type=jnp.float32)
    o_ref[...] = (out + b_ref[...]).astype(o_ref.dtype)


def parallel_lowrank_forward(x, U, S, V, bias, r, *,
                             tile_b=256, tile_n=512,
                             compute_dtype=jnp.bfloat16,
                             out_dtype=None,
                             single_buffer_resident=False,
                             vmem_limit_bytes=None,
                             use_xla_for_tiny=False):
    """Pallas implementation of ParallelLowRankLayer.forward."""
    B, input_size = x.shape
    output_size = V.shape[0]
    if out_dtype is None:
        out_dtype = x.dtype
    cd = jnp.dtype(compute_dtype)
    cd_bytes = cd.itemsize
    x_bytes = jnp.dtype(x.dtype).itemsize
    out_bytes = jnp.dtype(out_dtype).itemsize

    # ---- wrapper glue (plain JAX, once per call; weights only, never x) ----
    W = U[:, :r].astype(jnp.float32) @ S[:r, :r].astype(jnp.float32)  # fold S
    Vt = V[:, :r].T                                                   # lane-dense out

    if use_xla_for_tiny and B * output_size < 128 * 128:
        # Sub-tile problems: per-grid-step overhead dominates; use fused XLA.
        y = (x.astype(jnp.float32) @ W) @ Vt.astype(jnp.float32)
        return (y + bias.astype(jnp.float32)).astype(out_dtype)

    # Rank padding: sublane minimum when r < 128 (W/Vt blocks span full r dim,
    # so the (8,128) block rule is satisfied by "equals full dim").
    sub_min = 8 * (4 // cd_bytes)             # 8 for f32, 16 for bf16
    if r >= 128:
        r_pad = _round_up(r, 128)
    else:
        r_pad = _round_up(max(r, 1), sub_min)

    # Batch tiling: avoid padding x when possible.
    bsub = max(8, 8 * 4 // x_bytes, 8 * 4 // out_bytes)
    if B <= tile_b:
        tile_b_eff = B                        # full dim -> no sublane constraint
        B_pad = B
    else:
        tile_b_eff = _round_up(min(tile_b, B), bsub)
        B_pad = _round_up(B, tile_b_eff)

    # Output tiling: no padding when output_size fits one tile.
    if output_size <= tile_n:
        tile_n_eff = output_size
        out_pad = output_size
    else:
        tile_n_eff = _round_up(min(tile_n, output_size), 128)
        out_pad = _round_up(output_size, tile_n_eff)

    x_in = x if B_pad == B else jnp.pad(x, ((0, B_pad - B), (0, 0)))
    W_p = jnp.pad(W, ((0, 0), (0, r_pad - r))).astype(compute_dtype)
    Vt_p = jnp.pad(Vt, ((0, r_pad - r), (0, out_pad - output_size))).astype(compute_dtype)
    b_p = jnp.pad(bias.astype(jnp.float32), (0, out_pad - output_size)).reshape(1, out_pad)

    grid = (B_pad // tile_b_eff, out_pad // tile_n_eff)
    n_out_tiles = grid[1]

    # VMEM budget from actual tile footprint (double-buffered streams + resident
    # weights + f32 intermediate), capped at 48 MiB (safe on v7x's 64 MiB VMEM).
    if vmem_limit_bytes is None:
        footprint = (2 * tile_b_eff * input_size * x_bytes          # x
                     + 2 * input_size * r_pad * cd_bytes            # W (folded)
                     + 2 * r_pad * out_pad * cd_bytes               # Vt resident
                     + 2 * tile_n_eff * 4                           # bias
                     + 2 * tile_b_eff * tile_n_eff * out_bytes      # out
                     + tile_b_eff * r_pad * 4)                      # xw intermediate
        vmem_limit_bytes = int(min(max(int(footprint * 1.25) + (2 << 20), 32 << 20),
                                   48 << 20))

    # Grid-invariant operands; optionally single-buffered (v7x VMEM relief).
    if single_buffer_resident:
        w_spec = pl.BlockSpec((input_size, r_pad), lambda i, j: (0, 0),
                              pipeline_mode=pl.Buffered(1))
        vt_spec = pl.BlockSpec((r_pad, out_pad), lambda i, j: (0, 0),
                               pipeline_mode=pl.Buffered(1))
    else:
        w_spec = pl.BlockSpec((input_size, r_pad), lambda i, j: (0, 0))
        vt_spec = pl.BlockSpec((r_pad, out_pad), lambda i, j: (0, 0))

    kernel = functools.partial(lowrank_kernel, tile_n=tile_n_eff,
                               n_out_tiles=n_out_tiles,
                               compute_dtype=compute_dtype)

    # Advisory cost hint with REAL (unpadded) dims.
    flops = 2 * B * (input_size * r + r * output_size)
    bytes_accessed = int(B * input_size * x_bytes
                         + input_size * r * cd_bytes
                         + r * output_size * cd_bytes
                         + output_size * 4
                         + B * output_size * out_bytes)

    out = pl.pallas_call(
        kernel,
        out_shape=jax.ShapeDtypeStruct((B_pad, out_pad), out_dtype),
        grid_spec=pltpu.PrefetchScalarGridSpec(
            num_scalar_prefetch=0,
            grid=grid,
            in_specs=[
                pl.BlockSpec((tile_b_eff, input_size), lambda i, j: (i, 0)),  # x
                w_spec,                                                       # U@S
                vt_spec,                                                      # V.T (resident)
                pl.BlockSpec((1, tile_n_eff), lambda i, j: (0, j)),           # bias
            ],
            out_specs=pl.BlockSpec((tile_b_eff, tile_n_eff), lambda i, j: (i, j)),
        ),
        compiler_params=pltpu.CompilerParams(
            dimension_semantics=("parallel", "parallel"),
            vmem_limit_bytes=vmem_limit_bytes,
        ),
        cost_estimate=pl.CostEstimate(
            flops=flops, transcendentals=0, bytes_accessed=bytes_accessed),
    )(x_in, W_p, Vt_p, b_p)

    if B_pad != B or out_pad != output_size:
        out = out[:B, :output_size]
    return out


def init_params(key, input_size, output_size, rank):
    """Deterministically replicate the module's __init__ parameter shapes."""
    r1 = 2 * rank
    k_u, k_v, k_s, k_b = jax.random.split(key, 4)
    U = jax.random.normal(k_u, (input_size, r1), dtype=jnp.float32)
    V = jax.random.normal(k_v, (output_size, r1), dtype=jnp.float32)
    U, _ = jnp.linalg.qr(U, mode="reduced")       # torch.linalg.qr(..., 'reduced')
    V, _ = jnp.linalg.qr(V, mode="reduced")
    sv = jax.random.normal(k_s, (r1,), dtype=jnp.float32) ** 2
    sv = jnp.sort(sv)[::-1]
    S = jnp.diag(sv)
    bias = jax.random.normal(k_b, (output_size,), dtype=jnp.float32)
    return U, S, V, bias


if __name__ == "__main__":
    key = jax.random.PRNGKey(0)
    k_case1, k_x1, k_case2, k_x2 = jax.random.split(key, 4)

    # ---- Case 1: small module-consistent shapes, 2 batch tiles, 1 out tile ----
    batch, input_size, output_size, rank = 16, 32, 16, 8
    r = int(0.5 * rank)  # == 4
    U, S, V, bias = init_params(k_case1, input_size, output_size, rank)
    x = jax.random.normal(k_x1, (batch, input_size), dtype=jnp.float32)
    ref = ((x @ U[:, :r]) @ S[:r, :r]) @ V[:, :r].T + bias

    # Exact f32 compute path.
    out_f32 = jax.block_until_ready(parallel_lowrank_forward(
        x, U, S, V, bias, r, tile_b=8, compute_dtype=jnp.float32))
    assert out_f32.shape == (batch, output_size)
    assert jnp.allclose(out_f32, ref, atol=1e-4, rtol=1e-4), "f32 mismatch vs reference"

    # Default bf16 MXU path (f32 accumulation), looser tolerance.
    out_bf16 = jax.block_until_ready(parallel_lowrank_forward(
        x, U, S, V, bias, r, tile_b=8))
    assert out_bf16.shape == (batch, output_size)
    assert jnp.allclose(out_bf16, ref, atol=2e-1, rtol=2e-1), "bf16 mismatch vs reference"

    # ---- Case 2: multi-tile grid (3 batch tiles x 2 out tiles) exercising the
    #      resident-Vt in-kernel lane-aligned column slice path ----
    batch2, in2, out2, rank2 = 48, 64, 256, 16
    r2 = int(0.5 * rank2)  # == 8
    U2, S2, V2, b2 = init_params(k_case2, in2, out2, rank2)
    x2 = jax.random.normal(k_x2, (batch2, in2), dtype=jnp.float32)
    ref2 = ((x2 @ U2[:, :r2]) @ S2[:r2, :r2]) @ V2[:, :r2].T + b2
    out2_ = jax.block_until_ready(parallel_lowrank_forward(
        x2, U2, S2, V2, b2, r2, tile_b=16, tile_n=128, compute_dtype=jnp.float32))
    assert out2_.shape == (batch2, out2)
    assert jnp.allclose(out2_, ref2, atol=1e-4, rtol=1e-4), "multi-tile mismatch"

    # TODO(synk): step()/BiasStep()/Truncate() (QR/SVD rank-adaptive optimizer
    # updates) are host-side training logic, not part of the forward pass.
    print("KERNEL_OK")
</pallas_src>

<mosaic_0001>
module attributes {stable_mosaic.version = 11 : i64} {
  func.func @lowrank_kernel(%arg0: i32, %arg1: i32, %arg2: memref<8x32xf32, #tpu.memory_space<vmem>>, %arg3: memref<32x8xf32, #tpu.memory_space<vmem>>, %arg4: memref<8x16xf32, #tpu.memory_space<vmem>>, %arg5: memref<1x16xf32, #tpu.memory_space<vmem>>, %arg6: memref<8x16xf32, #tpu.memory_space<vmem>>) attributes {dimension_semantics = [#tpu.dimension_semantics<parallel>, #tpu.dimension_semantics<parallel>], iteration_bounds = array<i64: 2, 1>, scalar_prefetch = 0 : i64, scratch_operands = 0 : i64, tpu.core_type = #tpu.core_type<tc>, window_params = [{transform_indices = @transform_0, window_bounds = array<i64: 8, 32>}, {pipeline_mode = #tpu.pipeline_mode<synchronous>, transform_indices = @transform_1, window_bounds = array<i64: 32, 8>}, {pipeline_mode = #tpu.pipeline_mode<synchronous>, transform_indices = @transform_2, window_bounds = array<i64: 8, 16>}, {transform_indices = @transform_3, window_bounds = array<i64: 1, 16>}, {transform_indices = @transform_4, window_bounds = array<i64: 8, 16>}]} {
    %c0 = arith.constant 0 : index
    %c0_0 = arith.constant 0 : index
    %0 = vector.load %arg2[%c0, %c0_0] : memref<8x32xf32, #tpu.memory_space<vmem>>, vector<8x32xf32>
    %c0_1 = arith.constant 0 : index
    %c0_2 = arith.constant 0 : index
    %1 = vector.load %arg3[%c0_1, %c0_2] : memref<32x8xf32, #tpu.memory_space<vmem>>, vector<32x8xf32>
    %cst = arith.constant dense<0.000000e+00> : vector<8x8xf32>
    %2 = tpu.matmul %0, %1, %cst {dimension_numbers = #tpu.dot_dimension_numbers<[1], [0], [0], [1], [0, 0, 1, 1], [], []>} : vector<8x32xf32>, vector<32x8xf32>, vector<8x8xf32> -> vector<8x8xf32>
    %c0_3 = arith.constant 0 : index
    %c0_4 = arith.constant 0 : index
    %3 = vector.load %arg4[%c0_3, %c0_4] : memref<8x16xf32, #tpu.memory_space<vmem>>, vector<8x16xf32>
    %cst_5 = arith.constant dense<0.000000e+00> : vector<8x16xf32>
    %4 = tpu.matmul %2, %3, %cst_5 {dimension_numbers = #tpu.dot_dimension_numbers<[1], [0], [0], [1], [0, 0, 1, 1], [], []>} : vector<8x8xf32>, vector<8x16xf32>, vector<8x16xf32> -> vector<8x16xf32>
    %c0_6 = arith.constant 0 : index
    %c0_7 = arith.constant 0 : index
    %5 = vector.load %arg5[%c0_6, %c0_7] : memref<1x16xf32, #tpu.memory_space<vmem>>, vector<1x16xf32>
    %6 = vector.broadcast %5 : vector<1x16xf32> to vector<8x16xf32>
    %7 = arith.addf %4, %6 : vector<8x16xf32>
    %c0_8 = arith.constant 0 : index
    %c0_9 = arith.constant 0 : index
    %8 = vector.load %arg6[%c0_8, %c0_9] : memref<8x16xf32, #tpu.memory_space<vmem>>, vector<8x16xf32>
    tpu.vector_store %arg6[%c0_8, %c0_9], %7 {strides = array<i32>} : memref<8x16xf32, #tpu.memory_space<vmem>>, vector<8x16xf32>,
    return
  }
  func.func @transform_0(%arg0: i32, %arg1: i32) -> (i32, i32) {
    %c0_i32 = arith.constant 0 : i32
    %c0_i32_0 = arith.constant 0 : i32
    return %arg0, %c0_i32 : i32, i32
  }
  func.func @transform_1(%arg0: i32, %arg1: i32) -> (i32, i32) {
    %c0_i32 = arith.constant 0 : i32
    %c0_i32_0 = arith.constant 0 : i32
    %c0_i32_1 = arith.constant 0 : i32
    return %c0_i32, %c0_i32_0 : i32, i32
  }
  func.func @transform_2(%arg0: i32, %arg1: i32) -> (i32, i32) {
    %c0_i32 = arith.constant 0 : i32
    %c0_i32_0 = arith.constant 0 : i32
    %c0_i32_1 = arith.constant 0 : i32
    return %c0_i32, %c0_i32_0 : i32, i32
  }
  func.func @transform_3(%arg0: i32, %arg1: i32) -> (i32, i32) {
    %c0_i32 = arith.constant 0 : i32
    %c0_i32_0 = arith.constant 0 : i32
    return %c0_i32, %arg1 : i32, i32
  }
  func.func @transform_4(%arg0: i32, %arg1: i32) -> (i32, i32) {
    %c0_i32 = arith.constant 0 : i32
    return %arg0, %arg1 : i32, i32
  }
}

</mosaic_0001>

<bundles_post_ra>
// kernel: tpu_custom_call.1
= control target key start
LH: loop header
LB: loop body
LE: loop exit
PB: predicated region body
PF: predicated region fallthrough
CT: control target
= control target key end

     0   :  { %9 = vsyncpa [#allocation3], 0  ;;  %s803_s0 = inlined_call_operand.vmem [shape: f32[16,32], index: 0, kind: input, shape index: {}]   ;;  %s804_s1 = inlined_call_operand.vmem [shape: f32[32,8], index: 1, kind: input, shape index: {}]   ;;  %s805_s2 = inlined_call_operand.vmem [shape: f32[8,16], index: 2, kind: input, shape index: {}]   ;;  %s806_s3 = inlined_call_operand.vmem [shape: f32[1,16], index: 3, kind: input, shape index: {}]   ;;  %s807_s4 = inlined_call_operand.hbm [shape: f32[16,16], index: 4, kind: output, shape index: {}]  }
   0x1   :  { %11 = vsyncpa [#allocation3 + $0x1], 0  ;;  %s680_s15 = smov 0   ;;  %s682_s16 = smov 0  }
   0x2   :  { %s684_s17 = smov 0   ;;  %s686_s18 = smov 0  }
   0x3   :  { %s688_s19 = smov 0   ;;  %s690_s20 = smov 0  }
   0x4 LB: > { %s479_s21 = sadd.s32 4294967295, %s650_s20   ;;  %s480_s22 = sadd.s32 4294967294, %s650_s20   ;;  %s650_s20 = sphi %s690_s20, %s17_s20   ;;  %s646_s19 = sphi %s688_s19, %s814_s19   ;;  %s642_s18 = sphi %s686_s18, %s813_s18   ;;  %s638_s17 = sphi %s684_s17, %s812_s17   ;;  %s634_s16 = sphi %s682_s16, %s811_s16   ;;  %s630_s15 = sphi %s680_s15, %s810_s15  }
   0x5   : > { %s29_s23 = sadd.s32 1, %s646_s19  ;;  %s132_s24 = sadd.s32 1, %s638_s17 }
   0x6   : > { %p31_p0 = scmp.ge.s32.totalorder %s29_s23, 2  ;;  %p142_p1 = scmp.ne.s32.totalorder %s638_s17, %s634_s16 }
   0x7   : > { %p143_p2 = scmp.eq.s32.totalorder %s479_s21, 1  ;;  %p148_p3 = scmp.ne.s32.totalorder %s634_s16, %s630_s15 }
   0x8   : > { %s816_s23 = smov (%p31_p0, %s29_s23), 0  ;;  %p149_p5 = scmp.eq.s32.totalorder %s480_s22, 1 }
   0x9   : > { %p720_p4 = por %p143_p2, %p142_p1  ;;  %s127_s26 = ssub.s32 %s646_s19, %s816_s23 }
   0xa   : > { %p484_p6 = scmp.ge.s32.totalorder %s650_s20, 1  ;;  %p130_p7 = scmp.eq.s32.totalorder %s127_s26, 0 }
   0xb   : > { %p727_p8 = por %p149_p5, %p148_p3  ;;  %p186_p9 = scmp.lt.s32.totalorder %s650_s20, 3 }
   0xc   : > { %s733_s28 = scalar_select %p130_p7, %s638_s17, %s132_s24  }
   0xd   : > { %p187_p10 = pnand %p484_p6, %p186_p9 }
   0xe   : > { %p214_p11 = scmp.lt.s32.totalorder (!%p187_p10), %s642_s18, 1  ;;  %s211_s26 = sand.u32 (!%p187_p10), 1, %s634_s16  }
   0xf   : > { %190 = sbr.rel (%p187_p10) target bundleno = 430 (0x1ae), region = 36  ;;  %s485_s29 = sshll.u32 (!%p187_p10), %s211_s26, 3 }
  0x10   : > { %s491_s6 = sshll.u32 (!%p187_p10), %s642_s18, 7  ;;  %s385_s12 = scalar_lea.sflag (!%p187_p10), [#allocation3], %s211_s26 }
  0x11   : > { %s763_s11 = scalar_lea.hbm (!%p187_p10), %s807_s4, %s491_s6 }
  0x14   : > { %v225_v0 = vld [vmem:[%s804_s1 + $0x18] sm:$0xff]  ;;  %v652_v1 = vmov 0.0   ;;  %v224_v2 = vld [vmem:[%s804_s1 + $0x10] sm:$0xff]  ;;  %vm653_vm0 = vmmov 0   ;;  %s215_s7 = scalar_select %p214_p11, %s642_s18, 1  ;;  %v223_v3 = vld [vmem:[%s804_s1 + $0x8] sm:$0xff] }
  0x15   : > { %501 = vmatprep.subr.mxu0 %v652_v1  ;;  %509 = vmatprep.mubr.msk.f32.mxu0 %vm653_vm0, %v652_v1  ;;  %v222_v4 = vld [vmem:[%s804_s1] sm:$0xff]  ;;  %vm226_vm1 = vcmask 261120   ;;  %vm308_vm2 = vcmask 64512   ;;  %vm382_vm3 = vcmask 130048   ;;  %s654_s18 = smov [#allocation2]  }
  0x16   : > { %502 = vmatpush3.msra.mxu0 %v225_v0  ;;  %512 = vmatprep.subr.mxu1 %v652_v1  ;;  %s486_s10 = sshll.u32 %s215_s7, 3  ;;  %v300_v6 = vld [vmem:[%s805_s2] sm:$0xff]  ;;  %s213_s7 = scalar_lea.vmem [#allocation2], %s485_s29 }
  0x17   : > { %503 = vmatprep.subr.mxu0 %v652_v1  ;;  %514 = vmatprep.mubr.msk.f32.mxu1 %vm653_vm0, %v652_v1  ;;  %s217_s21 = scalar_lea.vmem %s803_s0, %s486_s10  ;;  %v488_v9 = vld [vmem:[%s806_s3] ss:$0 sm:$0xff]  ;;  %s399_s8 = sshll.u32 %s213_s7, 4  ;;  %s400_s8 = int_to_ptr.vmem [resolvable:$true] %s399_s8 }
  0x18   : > { %504 = vmatpush3.msra.mxu0 %v224_v2  ;;  %v221_v5 = vld [vmem:[%s217_s21] sm:$0xff]  ;;  %513 = vmatpush3.msra.mxu1 %v300_v6  ;;  %s574_s13 = scalar_lea.vmem %s400_s8, 128  ;;  %s578_s14 = sshll.u32 %s654_s18, 4  ;;  %s579_s14 = int_to_ptr.vmem [resolvable:$false] %s578_s14 }
  0x19   : > { %505 = vmatprep.subr.mxu0 %v652_v1  ;;  %p575_p12 = scmp.ne.s32.totalorder %s400_s8, %s574_s13  ;;  %s580_s21 = scalar_lea.vmem %s579_s14, 256 }
  0x1a   : > { %506 = vmatpush3.msra.mxu0 %v223_v3  ;;  %p581_p1 = scmp.lt.s32.totalorder %s400_s8, %s579_s14  ;;  %p582_p2 = scmp.lt.s32.totalorder %s580_s21, %s574_s13 }
  0x1b   : > { %507 = vmatprep.subr.mxu0 %v652_v1  ;;  %p576_p13 = pnand %p575_p12, %p720_p4 }
  0x1c   : > { %508 = vmatpush3.msra.mxu0 %v222_v4  ;;  %p583_p3 = por %p582_p2, %p581_p1 }
  0x1d   : > { %510 = vmatmul.mubr.msk.f32.vlgmr.msra.gmra.mxu0 %vm226_vm1, %v221_v5  ;;  %p577_p0 = pneg %p576_p13 }
  0x1f   : > { %p584_p5 = pnand %p583_p3, %p577_p0 }
  0xdd   : > { %v296_v7 = vpop.f32.mrf.mxu0 }
  0xde   : > { %515 = vmatmul.mubr.msk.f32.vlgmr.msra.gmra.mxu1 %vm308_vm2, %v296_v7 }
  0xdf   : > { %v511_v8 = vpop.f32.mrf.mxu0 }
 0x19e   : > { %v378_v10 = vpop.f32.mrf.mxu1 }
 0x19f   : > { %v379_v11 = vadd.f32 %v488_v9, %v378_v10 }
 0x1a0   : > { %v516_v12 = vpop.f32.mrf.mxu1 }
 0x1a1   : > { %383 = vst.msk [vmem:[%s213_s7] sm:$0xff] %vm382_vm3, %v379_v11 }
 0x1a2   : > { %587 = shalt.err (!%p584_p5)
}
 0x1a3   : > { %s588_s22 = scalar_lea.hbm %s763_s11, 128  ;;  %s592_s29 = scalar_lea.hbm %s807_s4, 256 }
 0x1a4   : > { %p589_p6 = scmp.ne.s32.totalorder %s763_s11, %s588_s22  ;;  %p593_p10 = scmp.lt.s32.totalorder %s763_s11, %s807_s4 }
 0x1a5   : > { %p594_p11 = scmp.lt.s32.totalorder %s592_s29, %s588_s22 }
 0x1a6   : > { %p590_p7 = pnand %p589_p6, %p720_p4 }
 0x1a7   : > { %p595_p12 = por %p594_p11, %p593_p10 }
 0x1a8   : > { %p591_p9 = pneg %p590_p7 }
 0x1aa   : > { %p596_p13 = pnand %p595_p12, %p591_p9 }
 0x1ac   : > { %599 = shalt.err (!%p596_p13)
}
 0x1ad   : > { %517 = dma.vmem_to_hbm [thread:$0]  (%p720_p4), %s400_s8, 128, %s763_s11, %s385_s12  }
 0x1ae PF: > { %p523_p0 = scmp.ge.s32.totalorder %s650_s20, 2  ;;  %s411_s6 = sand.u32 1, %s630_s15  }
 0x1af   : > { %s412_s7 = scalar_lea.sflag [#allocation3], %s411_s6 }
 0x1b0   : > { %p520_p1 = pnand %p523_p0, %p727_p8 }
 0x1b2   : > { %p521_p2 = pneg %p520_p1 }
 0x1b4   : > { %625 = dma.done.wait (%p521_p2), %s412_s7, 128  }
 0x1b5   : > { %627 = vsyncadd (%p521_p2), %s412_s7, 4294967168  ;;  %s17_s20 = sadd.s32 1, %s650_s20   ;;  %s810_s15 = smov %s634_s16 }
 0x1b6   : > { %p14_p3 = scmp.ge.s32.totalorder %s17_s20, 4   ;;  %s811_s16 = smov %s638_s17 }
 0x1b7   : > { %s812_s17 = smov %s733_s28  ;;  %s813_s18 = smov %s646_s19 }
 0x1b8   : > { %s814_s19 = smov %s816_s23  ;;  %16 = sbr.rel (!%p14_p3) target bundleno = 4 (0x4), region = 74 }
 0x1bd   :  { %417 = vsyncpa [#allocation3], 1 }
 0x1be   :  { %419 = vsyncpa [#allocation3 + $0x1], 1 }

</bundles_post_ra>
